<compile_context>
chip_gen: v7x
topology: tpu7x:2x2x1
jax: 0.10.0
libtpu: 0.0.40
codegen_flags: <defaults>
</compile_context>

<pallas_src>
import math

import jax
import jax.numpy as jnp
from jax.experimental import pallas as pl
from jax.experimental.pallas import tpu as pltpu

_SQRT_2_OVER_PI = math.sqrt(2.0 / math.pi)


def _gelu_kernel(x_ref, o_ref):
    x = x_ref[...]
    # Compute in f32 regardless of storage dtype (EUP/VALU slack is free for
    # an HBM-bound elementwise kernel; avoids bf16 emulation & precision loss).
    xf = x.astype(jnp.float32)
    inner = jnp.float32(_SQRT_2_OVER_PI) * (
        xf + jnp.float32(0.044715) * xf * xf * xf
    )
    y = jnp.float32(0.5) * xf * (jnp.float32(1.0) + jnp.tanh(inner))
    o_ref[...] = y.astype(o_ref.dtype)


# Per-buffer tile budget: 4 buffers (double-buffered in + out) x 8 MiB = 32 MiB,
# comfortably under the 48 MiB scoped limit we request (and under v7x's 64 MiB
# physical VMEM per TensorCore).
_TILE_BYTES_BUDGET = 8 * 1024 * 1024
_VMEM_LIMIT_BYTES = 48 * 1024 * 1024
_MAX_BLOCK_ROWS = 1024


def gelu(x):
    """Tanh-approximation GELU, elementwise, any shape."""
    orig_shape = x.shape
    orig_dtype = x.dtype

    # Flatten to a 2-D (rows, last_dim) slab — pure metadata, no HBM traffic.
    if x.ndim == 0:
        x2 = x.reshape(1, 1)
    elif x.ndim == 1:
        x2 = x.reshape(1, -1)
    else:
        x2 = x.reshape(-1, x.shape[-1])

    R, C = x2.shape
    itemsize = jnp.dtype(orig_dtype).itemsize

    # Sublane packing: rows per 32-bit sublane group.
    if itemsize >= 4:
        row_align = 8
    elif itemsize == 2:
        row_align = 16
    else:
        row_align = 32

    # Largest row tile (multiple of the sublane packing) that fits the budget.
    row_bytes = C * itemsize
    rows_by_vmem = (_TILE_BYTES_BUDGET // max(row_bytes, 1)) // row_align * row_align
    block_rows = min(_MAX_BLOCK_ROWS, max(row_align, rows_by_vmem))

    if block_rows >= R:
        # Full-extent block along rows (always layout-legal), single grid step.
        block_rows = R
        grid_rows = 1
    else:
        # block_rows is a multiple of row_align; Pallas masks the ragged tail.
        grid_rows = pl.cdiv(R, block_rows)

    n_elems = R * C
    cost = pl.CostEstimate(
        flops=8 * n_elems,
        transcendentals=n_elems,
        bytes_accessed=2 * n_elems * itemsize,
    )

    out = pl.pallas_call(
        _gelu_kernel,
        out_shape=jax.ShapeDtypeStruct((R, C), orig_dtype),
        grid_spec=pltpu.PrefetchScalarGridSpec(
            num_scalar_prefetch=0,
            grid=(grid_rows,),
            # Lane-dense: last dim is kept full-width in every block.
            in_specs=[pl.BlockSpec((block_rows, C), lambda i: (i, 0))],
            out_specs=pl.BlockSpec((block_rows, C), lambda i: (i, 0)),
        ),
        compiler_params=pltpu.CompilerParams(
            dimension_semantics=("parallel",),
            vmem_limit_bytes=_VMEM_LIMIT_BYTES,
        ),
        cost_estimate=cost,
    )(x2)

    return out.reshape(orig_shape)


def gelu_ref(x):
    xf = x.astype(jnp.float32)
    y = 0.5 * xf * (1.0 + jnp.tanh(_SQRT_2_OVER_PI * (xf + 0.044715 * xf**3)))
    return y.astype(x.dtype)


if __name__ == "__main__":
    key = jax.random.PRNGKey(0)
    # Small transformer-MLP-activation-like shape: (batch, seq, hidden).
    x = jax.random.normal(key, (2, 8, 32), dtype=jnp.float32)

    y = jax.block_until_ready(gelu(x))
    y_ref = gelu_ref(x)
    assert y.shape == x.shape and y.dtype == x.dtype
    assert jnp.allclose(y, y_ref, atol=1e-6, rtol=1e-6), "f32 mismatch vs reference"

    # Quick bf16 check (exercises the in-kernel f32 upcast path).
    xb = x.astype(jnp.bfloat16)
    yb = jax.block_until_ready(gelu(xb))
    assert yb.shape == xb.shape and yb.dtype == xb.dtype
    assert jnp.allclose(
        yb.astype(jnp.float32), gelu_ref(xb).astype(jnp.float32), atol=2e-2, rtol=2e-2
    ), "bf16 mismatch vs reference"

    print("KERNEL_OK")
</pallas_src>

<mosaic_0001>
module attributes {stable_mosaic.version = 11 : i64} {
  func.func @_gelu_kernel(%arg0: i32, %arg1: memref<16x32xf32, #tpu.memory_space<vmem>>, %arg2: memref<16x32xf32, #tpu.memory_space<vmem>>) attributes {dimension_semantics = [#tpu.dimension_semantics<parallel>], iteration_bounds = array<i64: 1>, scalar_prefetch = 0 : i64, scratch_operands = 0 : i64, tpu.core_type = #tpu.core_type<tc>, window_params = [{transform_indices = @transform_0, window_bounds = array<i64: 16, 32>}, {transform_indices = @transform_1, window_bounds = array<i64: 16, 32>}]} {
    %c0 = arith.constant 0 : index
    %c0_0 = arith.constant 0 : index
    %0 = vector.load %arg1[%c0, %c0_0] : memref<16x32xf32, #tpu.memory_space<vmem>>, vector<16x32xf32>
    %cst = arith.constant 4.471500e-02 : f32
    %1 = vector.broadcast %cst : f32 to vector<16x32xf32>
    %2 = arith.mulf %1, %0 : vector<16x32xf32>
    %3 = arith.mulf %2, %0 : vector<16x32xf32>
    %4 = arith.mulf %3, %0 : vector<16x32xf32>
    %5 = arith.addf %0, %4 : vector<16x32xf32>
    %cst_1 = arith.constant 0.797884583 : f32
    %6 = vector.broadcast %cst_1 : f32 to vector<16x32xf32>
    %7 = arith.mulf %6, %5 : vector<16x32xf32>
    %cst_2 = arith.constant 5.000000e-01 : f32
    %8 = vector.broadcast %cst_2 : f32 to vector<16x32xf32>
    %9 = arith.mulf %8, %0 : vector<16x32xf32>
    %10 = math.tanh %7 : vector<16x32xf32>
    %cst_3 = arith.constant 1.000000e+00 : f32
    %11 = vector.broadcast %cst_3 : f32 to vector<16x32xf32>
    %12 = arith.addf %11, %10 : vector<16x32xf32>
    %13 = arith.mulf %9, %12 : vector<16x32xf32>
    %c0_4 = arith.constant 0 : index
    %c0_5 = arith.constant 0 : index
    %14 = vector.load %arg2[%c0_4, %c0_5] : memref<16x32xf32, #tpu.memory_space<vmem>>, vector<16x32xf32>
    tpu.vector_store %arg2[%c0_4, %c0_5], %13 {strides = array<i32>} : memref<16x32xf32, #tpu.memory_space<vmem>>, vector<16x32xf32>,
    return
  }
  func.func @transform_0(%arg0: i32) -> (i32, i32) {
    %c0_i32 = arith.constant 0 : i32
    %c0_i32_0 = arith.constant 0 : i32
    return %arg0, %c0_i32 : i32, i32
  }
  func.func @transform_1(%arg0: i32) -> (i32, i32) {
    %c0_i32 = arith.constant 0 : i32
    %c0_i32_0 = arith.constant 0 : i32
    return %arg0, %c0_i32 : i32, i32
  }
}

</mosaic_0001>

<bundles_post_ra>
// kernel: tpu_custom_call.1
= control target key start
LH: loop header
LB: loop body
LE: loop exit
PB: predicated region body
PF: predicated region fallthrough
CT: control target
= control target key end

     0   :  { %6 = vsyncpa [#allocation3], 0  ;;  %s163_s0 = inlined_call_operand.hbm [shape: f32[16,32], index: 0, kind: input, shape index: {}]   ;;  %s164_s1 = inlined_call_operand.hbm [shape: f32[16,32], index: 1, kind: output, shape index: {}]  }
   0x1   :  { %7 = vsyncpa [#allocation4], 0  ;;  %s119_s6 = smov [#allocation2]   ;;  %s71_s10 = scalar_lea.hbm %s163_s0, 256 }
   0x2   :  { %s13_s7 = sshll.u32 %s119_s6, 4  ;;  %p72_p0 = scmp.ne.s32.totalorder %s163_s0, %s71_s10  ;;  %s14_s7 = int_to_ptr.vmem [resolvable:$true] %s13_s7 }
   0x3   :  { %p75_p1 = scmp.lt.u32.totalorder %s71_s10, %s163_s0 }
   0x5   :  { %p77_p2 = pnand %p75_p1, %p72_p0 }
   0x7   :  { %80 = shalt.err (!%p77_p2)
}
   0x8   :  { %s81_s15 = scalar_lea.vmem %s14_s7, 256  ;;  %p86_p4 = scmp.lt.s32.totalorder %s14_s7, %s14_s7 }
   0x9   :  { %p82_p3 = scmp.ne.s32.totalorder %s14_s7, %s81_s15  ;;  %p87_p5 = scmp.lt.s32.totalorder %s81_s15, %s81_s15 }
   0xb   :  { %p88_p6 = por %p87_p5, %p86_p4 }
   0xd   :  { %p89_p7 = pnand %p88_p6, %p82_p3 }
   0xf   :  { %92 = shalt.err (!%p89_p7)
}
  0x10   :  { %s120_s16 = smov 128   ;;  %s121_s17 = smov 8  }
  0x11   :  { %19 = dma.hbm_to_vmem [thread:$0]  %s163_s0, 256, %s14_s7, [#allocation3], %s120_s16, %s120_s16, %s121_s17  }
  0x12   :  { %115 = dma.done.wait [#allocation3], 256  }
  0x13   :  { %116 = vsyncadd [#allocation3], 4294967040  ;;  %v23_v0 = vld [vmem:[#allocation2] sm:$0xff]  ;;  %v24_v1 = vld [vmem:[#allocation2 + $0x8] sm:$0xff]  ;;  %s122_s0 = smov [#allocation5]   ;;  %vm43_vm0 = vcmask 261120  }
  0x14   :  { %v25_v2 = vmul.f32 0.044715, %v23_v0  ;;  %v26_v3 = vmul.f32 0.044715, %v24_v1  ;;  %v35_v12 = vmul.f32 0.5, %v23_v0  ;;  %v36_v14 = vmul.f32 0.5, %v24_v1 }
  0x15   :  { %s51_s20 = sshll.u32 %s122_s0, 4  ;;  %s52_s20 = int_to_ptr.vmem [resolvable:$true] %s51_s20 }
  0x16   :  { %v27_v4 = vmul.f32 %v25_v2, %v23_v0  ;;  %v28_v5 = vmul.f32 %v26_v3, %v24_v1  ;;  %s93_s21 = scalar_lea.vmem %s52_s20, 256  ;;  %p98_p9 = scmp.lt.s32.totalorder %s52_s20, %s52_s20 }
  0x17   :  { %p94_p8 = scmp.ne.s32.totalorder %s52_s20, %s93_s21  ;;  %p99_p10 = scmp.lt.s32.totalorder %s93_s21, %s93_s21 }
  0x18   :  { %v29_v6 = vmul.f32 %v27_v4, %v23_v0  ;;  %v30_v7 = vmul.f32 %v28_v5, %v24_v1 }
  0x19   :  { %p100_p11 = por %p99_p10, %p98_p9 }
  0x1a   :  { %v31_v8 = vadd.f32 %v29_v6, %v23_v0  ;;  %v32_v9 = vadd.f32 %v30_v7, %v24_v1 }
  0x1b   :  { %p101_p12 = pnand %p100_p11, %p94_p8 }
  0x1c   :  { %v33_v10 = vmul.f32 0.7978846, %v31_v8  ;;  %v34_v11 = vmul.f32 0.7978846, %v32_v9 }
  0x1e   :  { %67 = vtanh.f32 %v33_v10 }
  0x1f   :  { %69 = vtanh.f32 %v34_v11 }
  0x28   :  { %v68_v13 = vpop.eup %67 }
  0x29   :  { %v70_v15 = vpop.eup %69  ;;  %v39_v16 = vadd.f32 1.0, %v68_v13 }
  0x2a   :  { %v40_v17 = vadd.f32 1.0, %v70_v15 }
  0x2b   :  { %v41_v18 = vmul.f32 %v39_v16, %v35_v12 }
  0x2c   :  { %v42_v19 = vmul.f32 %v40_v17, %v36_v14 }
  0x2d   :  { %44 = vst.msk [vmem:[#allocation5] sm:$0xff] %vm43_vm0, %v41_v18 }
  0x2e   :  { %45 = vst.msk [vmem:[#allocation5 + $0x8] sm:$0xff] %vm43_vm0, %v42_v19 }
  0x2f   :  { %104 = shalt.err (!%p101_p12)
}
  0x30   :  { %s105_s24 = scalar_lea.hbm %s164_s1, 256 }
  0x31   :  { %p106_p13 = scmp.ne.s32.totalorder %s164_s1, %s105_s24  ;;  %p109_p0 = scmp.lt.u32.totalorder %s105_s24, %s164_s1 }
  0x33   :  { %p111_p1 = pnand %p109_p0, %p106_p13 }
  0x35   :  { %114 = shalt.err (!%p111_p1)
}
  0x36   :  { %57 = dma.vmem_to_hbm [thread:$0]  %s52_s20, 256, %s164_s1, [#allocation4], %s120_s16, %s120_s16, %s121_s17  }
  0x37   :  { %117 = dma.done.wait [#allocation4], 256  }
  0x38   :  { %118 = vsyncadd [#allocation4], 4294967040 }
  0x39   :  { %61 = vsyncpa [#allocation3], 1 }
  0x3a   :  { %62 = vsyncpa [#allocation4], 1 }

</bundles_post_ra>
